<compile_context>
chip_gen: v5e
topology: v5e:2x2
jax: 0.10.0
libtpu: 0.0.40
codegen_flags: <defaults>
</compile_context>

<pallas_src>
import jax
import jax.numpy as jnp
from jax.experimental import pallas as pl
from jax.experimental.pallas import tpu as pltpu


# ---------------------------------------------------------------------------
# Kernels
# ---------------------------------------------------------------------------

def _linear_bias_kernel(x_ref, w_ref, b_ref, o_ref, acc_ref):
    """One (m, n) output tile; accumulate over the K grid axis in f32."""
    k = pl.program_id(2)

    @pl.when(k == 0)
    def _():
        acc_ref[...] = jnp.zeros_like(acc_ref)

    acc_ref[...] += jnp.dot(x_ref[...], w_ref[...],
                            preferred_element_type=jnp.float32)

    @pl.when(k == pl.num_programs(2) - 1)
    def _():
        o_ref[...] = (acc_ref[...] +
                      b_ref[...].astype(jnp.float32)).astype(o_ref.dtype)


def _linear_nobias_kernel(x_ref, w_ref, o_ref, acc_ref):
    """Bias-free specialization (no zero-bias DMA or epilogue add)."""
    k = pl.program_id(2)

    @pl.when(k == 0)
    def _():
        acc_ref[...] = jnp.zeros_like(acc_ref)

    acc_ref[...] += jnp.dot(x_ref[...], w_ref[...],
                            preferred_element_type=jnp.float32)

    @pl.when(k == pl.num_programs(2) - 1)
    def _():
        o_ref[...] = acc_ref[...].astype(o_ref.dtype)


# ---------------------------------------------------------------------------
# Wrapper
# ---------------------------------------------------------------------------

def _vmem_limit_bytes(tm, tn, tk, in_itemsize, out_itemsize, has_bias):
    """Scoped-VMEM budget: double-buffered I/O blocks + f32 accumulator."""
    need = (2 * tm * tk * in_itemsize          # x tile, double buffered
            + 2 * tk * tn * in_itemsize        # W tile, double buffered
            + 2 * tm * tn * out_itemsize       # out tile, double buffered
            + (2 * tn * 4 if has_bias else 0)  # bias tile
            + tm * tn * 4)                     # f32 accumulator scratch
    # 2x headroom for compiler internals; keep within v7x's 64 MiB physical.
    return int(min(max(2 * need, 16 * 1024 * 1024), 64 * 1024 * 1024))


def linear_net_forward(x, params, *, block_m=512, block_n=256, block_k=512,
                       compute_dtype=None):
    """JAX wrapper reproducing LinearNet.forward (inference semantics).

    x:       (..., in_features)
    params:  {"weight": (out_features, in_features),
              "bias":   (out_features,) or None}
    compute_dtype: optional dtype (e.g. jnp.bfloat16) for the MXU operands;
                   accumulation stays f32, output keeps x.dtype.
    """
    w = params["weight"]
    b = params.get("bias", None)
    out_features, in_features = w.shape
    assert x.shape[-1] == in_features, "last dim must equal in_features"

    out_dtype = x.dtype
    lead = x.shape[:-1]
    x2 = x.reshape(-1, in_features)          # flatten leading dims -> (M, In)
    M = x2.shape[0]

    # One-time wrapper transpose to (In, Out): constant-folded for static
    # weights, and removes any per-grid-step transpose of the weight tile.
    wT = w.T
    if compute_dtype is not None:
        x2 = x2.astype(compute_dtype)
        wT = wT.astype(compute_dtype)

    # Lane-dense output: pad tiny out_features up to 128 via the (static)
    # weight/bias so output stores are unmasked; valid columns sliced at end.
    n_eff = out_features
    if n_eff < 128:
        n_eff = 128
        wT = jnp.pad(wT, ((0, 0), (0, n_eff - out_features)))

    has_bias = b is not None
    if has_bias:
        b2 = b.reshape(1, out_features)
        if n_eff != out_features:
            b2 = jnp.pad(b2, ((0, 0), (0, n_eff - out_features)))

    # K tiling. K must never be read ragged (garbage would pollute every valid
    # output through the accumulation), so zero-pad K iff tk doesn't divide it.
    tk = min(block_k, in_features)
    k_eff = in_features
    if in_features % tk != 0:
        k_eff = pl.cdiv(in_features, tk) * tk
        x2 = jnp.pad(x2, ((0, 0), (0, k_eff - in_features)))
        wT = jnp.pad(wT, ((0, k_eff - in_features), (0, 0)))

    tm = min(block_m, M)
    tn = min(block_n, n_eff)
    grid = (pl.cdiv(M, tm), pl.cdiv(n_eff, tn), k_eff // tk)

    in_specs = [
        pl.BlockSpec((tm, tk), lambda m, n, k: (m, k)),   # x tile
        pl.BlockSpec((tk, tn), lambda m, n, k: (k, n)),   # W^T tile
    ]
    operands = [x2, wT]
    if has_bias:
        in_specs.append(pl.BlockSpec((1, tn), lambda m, n, k: (0, n)))
        operands.append(b2)
        kernel = _linear_bias_kernel
    else:
        kernel = _linear_nobias_kernel

    in_itemsize = x2.dtype.itemsize
    out_itemsize = jnp.dtype(out_dtype).itemsize
    flops = 2 * M * in_features * out_features
    bytes_accessed = (x2.size * in_itemsize
                      + wT.size * wT.dtype.itemsize
                      + (b2.size * b2.dtype.itemsize if has_bias else 0)
                      + M * n_eff * out_itemsize)

    out = pl.pallas_call(
        kernel,
        out_shape=jax.ShapeDtypeStruct((M, n_eff), out_dtype),
        grid=grid,
        in_specs=in_specs,
        out_specs=pl.BlockSpec((tm, tn), lambda m, n, k: (m, n)),
        scratch_shapes=[pltpu.VMEM((tm, tn), jnp.float32)],
        compiler_params=pltpu.CompilerParams(
            dimension_semantics=("parallel", "parallel", "arbitrary"),
            vmem_limit_bytes=_vmem_limit_bytes(
                tm, tn, tk, in_itemsize, out_itemsize, has_bias)),
        cost_estimate=pl.CostEstimate(flops=flops, transcendentals=0,
                                      bytes_accessed=bytes_accessed),
    )(*operands)

    if n_eff != out_features:
        out = out[:, :out_features]
    return out.reshape(*lead, out_features)


# ---------------------------------------------------------------------------
# Params / reference
# ---------------------------------------------------------------------------

def init_params(key, in_features, out_features, bias=True, gain=1.0):
    """Xavier-uniform weight (as in reset_parameters), zero bias."""
    bound = gain * (6.0 / (in_features + out_features)) ** 0.5
    w = jax.random.uniform(key, (out_features, in_features), jnp.float32,
                           minval=-bound, maxval=bound)
    params = {"weight": w}
    params["bias"] = jnp.zeros((out_features,), jnp.float32) if bias else None
    return params


def _reference(x, params):
    """Pure-JAX reference: F.linear(x, W, b)."""
    out = jnp.einsum("...i,oi->...o", x, params["weight"])
    if params.get("bias", None) is not None:
        out = out + params["bias"]
    return out


if __name__ == "__main__":
    key = jax.random.PRNGKey(0)
    k_p1, k_x1, k_p2, k_x2 = jax.random.split(key, 4)

    # 1) Module-consistent small config: (N, *, H_in) -> (N, *, H_out).
    #    Single-tile grid, out_features padded to a lane-dense 128.
    batch, seq = 2, 8
    in_f, out_f = 32, 16
    params1 = init_params(k_p1, in_f, out_f, bias=True, gain=1.0)
    x1 = jax.random.normal(k_x1, (batch, seq, in_f), jnp.float32)
    ref1 = _reference(x1, params1)
    out1 = jax.block_until_ready(linear_net_forward(x1, params1))
    assert out1.shape == (batch, seq, out_f)
    assert jnp.allclose(out1, ref1, atol=1e-5, rtol=1e-5)

    # 2) Bias-free specialized path at the same shapes.
    params_nb = init_params(k_p1, in_f, out_f, bias=False, gain=1.0)
    ref_nb = _reference(x1, params_nb)
    out_nb = jax.block_until_ready(linear_net_forward(x1, params_nb))
    assert jnp.allclose(out_nb, ref_nb, atol=1e-5, rtol=1e-5)

    # 3) M/N/K tiled path with ragged M and ragged N (masked boundary stores,
    #    no wrapper pad/slice on the batch axis), f32 accumulation over K.
    batch2, seq2 = 2, 7                      # M = 14 -> ragged with tm = 8
    in_f2, out_f2 = 256, 192                 # ragged N with tn = 128
    params2 = init_params(k_p2, in_f2, out_f2, bias=True, gain=1.0)
    x2 = jax.random.normal(k_x2, (batch2, seq2, in_f2), jnp.float32)
    ref2 = _reference(x2, params2)
    out2 = jax.block_until_ready(
        linear_net_forward(x2, params2, block_m=8, block_n=128, block_k=128))
    assert out2.shape == (batch2, seq2, out_f2)
    assert jnp.allclose(out2, ref2, atol=1e-4, rtol=1e-4)

    # 4) bf16 compute path (f32 accumulation), loose tolerance vs f32 ref.
    out_bf16 = jax.block_until_ready(
        linear_net_forward(x2, params2, compute_dtype=jnp.bfloat16))
    assert out_bf16.shape == (batch2, seq2, out_f2)
    assert jnp.allclose(out_bf16, ref2, atol=5e-2, rtol=5e-2)

    print("KERNEL_OK")
</pallas_src>

<mosaic_0001>
module attributes {stable_mosaic.version = 11 : i64} {
  func.func @_linear_bias_kernel(%arg0: i32, %arg1: i32, %arg2: i32, %arg3: memref<16x32xf32, #tpu.memory_space<vmem>>, %arg4: memref<32x128xf32, #tpu.memory_space<vmem>>, %arg5: memref<1x128xf32, #tpu.memory_space<vmem>>, %arg6: memref<16x128xf32, #tpu.memory_space<vmem>>, %arg7: memref<16x128xf32, #tpu.memory_space<vmem>>) attributes {dimension_semantics = [#tpu.dimension_semantics<parallel>, #tpu.dimension_semantics<parallel>, #tpu.dimension_semantics<arbitrary>], iteration_bounds = array<i64: 1, 1, 1>, scalar_prefetch = 0 : i64, scratch_operands = 1 : i64, tpu.core_type = #tpu.core_type<tc>, window_params = [{transform_indices = @transform_0, window_bounds = array<i64: 16, 32>}, {transform_indices = @transform_1, window_bounds = array<i64: 32, 128>}, {transform_indices = @transform_2, window_bounds = array<i64: 1, 128>}, {transform_indices = @transform_3, window_bounds = array<i64: 16, 128>}]} {
    %c0_i32 = arith.constant 0 : i32
    %0 = arith.cmpi eq, %arg2, %c0_i32 : i32
    %1 = arith.extui %0 : i1 to i32
    %c0_i32_0 = arith.constant 0 : i32
    %2 = arith.cmpi ne, %1, %c0_i32_0 : i32
    scf.if %2 {
      %cst_10 = arith.constant 0.000000e+00 : f32
      %12 = vector.broadcast %cst_10 : f32 to vector<16x128xf32>
      %c0_11 = arith.constant 0 : index
      %c0_12 = arith.constant 0 : index
      %13 = vector.load %arg7[%c0_11, %c0_12] : memref<16x128xf32, #tpu.memory_space<vmem>>, vector<16x128xf32>
      tpu.vector_store %arg7[%c0_11, %c0_12], %12 {strides = array<i32>} : memref<16x128xf32, #tpu.memory_space<vmem>>, vector<16x128xf32>,
    } else {
    }
    %c0 = arith.constant 0 : index
    %c0_1 = arith.constant 0 : index
    %3 = vector.load %arg7[%c0, %c0_1] : memref<16x128xf32, #tpu.memory_space<vmem>>, vector<16x128xf32>
    %c0_2 = arith.constant 0 : index
    %c0_3 = arith.constant 0 : index
    %4 = vector.load %arg3[%c0_2, %c0_3] : memref<16x32xf32, #tpu.memory_space<vmem>>, vector<16x32xf32>
    %c0_4 = arith.constant 0 : index
    %c0_5 = arith.constant 0 : index
    %5 = vector.load %arg4[%c0_4, %c0_5] : memref<32x128xf32, #tpu.memory_space<vmem>>, vector<32x128xf32>
    %cst = arith.constant dense<0.000000e+00> : vector<16x128xf32>
    %6 = tpu.matmul %4, %5, %cst {dimension_numbers = #tpu.dot_dimension_numbers<[1], [0], [0], [1], [0, 0, 1, 1], [], []>} : vector<16x32xf32>, vector<32x128xf32>, vector<16x128xf32> -> vector<16x128xf32>
    %7 = arith.addf %3, %6 : vector<16x128xf32>
    %c0_6 = arith.constant 0 : index
    %c0_7 = arith.constant 0 : index
    %8 = vector.load %arg7[%c0_6, %c0_7] : memref<16x128xf32, #tpu.memory_space<vmem>>, vector<16x128xf32>
    tpu.vector_store %arg7[%c0_6, %c0_7], %7 {strides = array<i32>} : memref<16x128xf32, #tpu.memory_space<vmem>>, vector<16x128xf32>,
    %c0_i32_8 = arith.constant 0 : i32
    %9 = arith.cmpi eq, %arg2, %c0_i32_8 : i32
    %10 = arith.extui %9 : i1 to i32
    %c0_i32_9 = arith.constant 0 : i32
    %11 = arith.cmpi ne, %10, %c0_i32_9 : i32
    scf.if %11 {
      %c0_10 = arith.constant 0 : index
      %c0_11 = arith.constant 0 : index
      %12 = vector.load %arg7[%c0_10, %c0_11] : memref<16x128xf32, #tpu.memory_space<vmem>>, vector<16x128xf32>
      %c0_12 = arith.constant 0 : index
      %c0_13 = arith.constant 0 : index
      %13 = vector.load %arg5[%c0_12, %c0_13] : memref<1x128xf32, #tpu.memory_space<vmem>>, vector<1x128xf32>
      %14 = vector.broadcast %13 : vector<1x128xf32> to vector<16x128xf32>
      %15 = arith.addf %12, %14 : vector<16x128xf32>
      %c0_14 = arith.constant 0 : index
      %c0_15 = arith.constant 0 : index
      %16 = vector.load %arg6[%c0_14, %c0_15] : memref<16x128xf32, #tpu.memory_space<vmem>>, vector<16x128xf32>
      tpu.vector_store %arg6[%c0_14, %c0_15], %15 {strides = array<i32>} : memref<16x128xf32, #tpu.memory_space<vmem>>, vector<16x128xf32>,
    } else {
    }
    return
  }
  func.func @transform_0(%arg0: i32, %arg1: i32, %arg2: i32) -> (i32, i32) {
    %c0_i32 = arith.constant 0 : i32
    return %arg0, %arg2 : i32, i32
  }
  func.func @transform_1(%arg0: i32, %arg1: i32, %arg2: i32) -> (i32, i32) {
    %c0_i32 = arith.constant 0 : i32
    return %arg2, %arg1 : i32, i32
  }
  func.func @transform_2(%arg0: i32, %arg1: i32, %arg2: i32) -> (i32, i32) {
    %c0_i32 = arith.constant 0 : i32
    %c0_i32_0 = arith.constant 0 : i32
    return %c0_i32, %arg1 : i32, i32
  }
  func.func @transform_3(%arg0: i32, %arg1: i32, %arg2: i32) -> (i32, i32) {
    %c0_i32 = arith.constant 0 : i32
    return %arg0, %arg1 : i32, i32
  }
}

</mosaic_0001>

<bundles_post_ra>
// kernel: tpu_custom_call.1
= control target key start
LH: loop header
LB: loop body
LE: loop exit
PB: predicated region body
PF: predicated region fallthrough
CT: control target
= control target key end

     0   :  { %8 = vsyncpa [#allocation4], 0  ;;  %s264_s0 = inlined_call_operand.hbm [shape: f32[16,32], index: 0, kind: input, shape index: {}]   ;;  %s265_s1 = inlined_call_operand.hbm [shape: f32[32,128], index: 1, kind: input, shape index: {}]   ;;  %s266_s2 = inlined_call_operand.vmem [shape: f32[1,128], index: 2, kind: input, shape index: {}]   ;;  %s267_s3 = inlined_call_operand.hbm [shape: f32[16,128], index: 3, kind: output, shape index: {}]  }
   0x1   :  { %9 = vsyncpa [#allocation7], 0 }
   0x2   :  { %10 = vsyncpa [#allocation5], 0  ;;  %s15_s14 = sshll.u32 %s264_s0, 4  ;;  %s218_s15 = smov [#allocation3]   ;;  %s16_s14 = int_to_ptr.hbm [resolvable:$true] %s15_s14 }
   0x3   :  { %s17_s16 = sshll.u32 %s218_s15, 4  ;;  %s28_s19 = sshll.u32 %s265_s1, 4  ;;  %s18_s16 = int_to_ptr.vmem [resolvable:$true] %s17_s16  ;;  %s29_s19 = int_to_ptr.hbm [resolvable:$true] %s28_s19 }
   0x4   :  { %s219_s20 = smov 128   ;;  %s220_s21 = smov 8  }
   0x5   :  { %23 = dma.hbm_to_vmem [thread:$0]  %s16_s14, 256, %s18_s16, [#allocation4], %s219_s20, %s219_s20, %s220_s21  }
   0x6   :  { %s221_s22 = smov [#allocation6]  }
   0x7   :  { %s30_s23 = sshll.u32 %s221_s22, 4  ;;  %s31_s23 = int_to_ptr.vmem [resolvable:$true] %s30_s23 }
   0x8   :  { %36 = dma.hbm_to_vmem [thread:$0]  %s29_s19, 512, %s31_s23, [#allocation7], %s219_s20, %s219_s20, %s220_s21  }
   0x9   :  { %212 = dma.done.wait [#allocation4], 256  }
   0xa   :  { %213 = vsyncadd [#allocation4], 4294967040 }
   0xb   :  { %214 = dma.done.wait [#allocation7], 512  }
   0xc   :  { %215 = vsyncadd [#allocation7], 4294966784  ;;  %v60_v0 = vld [vmem:[#allocation6 + $0x18] sm:$0xff]  ;;  %v59_v1 = vld [vmem:[#allocation6 + $0x10] sm:$0xff]  ;;  %vm61_vm0 = vcmask 261120   ;;  %s222_s24 = smov [#allocation8]  }
   0xd   :  { %80 = vmatpush.msra.mxu0 %v60_v0  ;;  %130 = vmatpush.msra.mxu1 %v60_v0  ;;  %v58_v2 = vld [vmem:[#allocation6 + $0x8] sm:$0xff]  ;;  %v57_v3 = vld [vmem:[#allocation6] sm:$0xff]  ;;  %v55_v4 = vld [vmem:[#allocation3] sm:$0xff]  ;;  %s112_s25 = sshll.u32 %s222_s24, 4  ;;  %s114_s28 = sshll.u32 %s267_s3, 4  ;;  %s113_s25 = int_to_ptr.vmem [resolvable:$true] %s112_s25  ;;  %s115_s28 = int_to_ptr.hbm [resolvable:$true] %s114_s28 }
   0xe   :  { %v56_v5 = vld [vmem:[#allocation3 + $0x8] sm:$0xff]  ;;  %v139_v6 = vld [vmem:[%s266_s2] ss:$0 sm:$0xff] }
   0xf   :  { %81 = vmatpush.msra.mxu0 %v59_v1  ;;  %131 = vmatpush.msra.mxu1 %v59_v1 }
  0x11   :  { %82 = vmatpush.msra.mxu0 %v58_v2  ;;  %132 = vmatpush.msra.mxu1 %v58_v2 }
  0x13   :  { %83 = vmatpush.msra.mxu0 %v57_v3  ;;  %133 = vmatpush.msra.mxu1 %v57_v3 }
  0x14   :  { %128 = vmatmul.msk.f32.vlgmr.msra.gmra.mxu0 %vm61_vm0, %v55_v4  ;;  %129 = vmatmul.msk.f32.vlgmr.msra.gmra.mxu1 %vm61_vm0, %v56_v5 }
  0x91   :  { %v85_v7 = vpop.f32.mrf.mxu0  ;;  %v88_v8 = vpop.f32.mrf.mxu1 }
  0x92   :  { %v104_v9 = vadd.f32 %v139_v6, %v85_v7  ;;  %v105_v10 = vadd.f32 %v139_v6, %v88_v8 }
  0x94   :  { %106 = vst [vmem:[#allocation8] sm:$0xff] %v104_v9 }
  0x95   :  { %107 = vst [vmem:[#allocation8 + $0x8] sm:$0xff] %v105_v10 }
  0x96   :  { %120 = dma.vmem_to_hbm [thread:$0]  %s113_s25, 256, %s115_s28, [#allocation5], %s219_s20, %s219_s20, %s220_s21  }
  0x97   :  { %216 = dma.done.wait [#allocation5], 256  }
  0x98   :  { %217 = vsyncadd [#allocation5], 4294967040 }
  0x99   :  { %125 = vsyncpa [#allocation4], 1 }
  0x9a   :  { %126 = vsyncpa [#allocation7], 1 }
  0x9b   :  { %127 = vsyncpa [#allocation5], 1 }

</bundles_post_ra>
